<compile_context>
chip_gen: v6e
topology: v6e:2x2x1
jax: 0.10.0
libtpu: 0.0.40
codegen_flags: <defaults>
</compile_context>

<pallas_src>
import functools

import jax
import jax.numpy as jnp
import numpy as np
from jax import lax
from jax.experimental import pallas as pl
from jax.experimental.pallas import tpu as pltpu

_ELEM_BYTES = 4                            # float32
_TARGET_BLOCK_BYTES = 4 * 1024 * 1024      # per-operand block target
_MAX_FUSED_BLOCK_BYTES = 6 * 1024 * 1024   # largest block accepted for fused path
_VMEM_LIMIT_BYTES = 48 * 1024 * 1024       # fits v7x (64 MiB) with headroom


# ---------------------------------------------------------------------------
# Fused path: the whole softmax dim (C) lives inside one block.
# ---------------------------------------------------------------------------
def _softmax_backward_fused_kernel(g_ref, y_ref, o_ref):
    # g_ref / y_ref / o_ref : (TB, C, TL) float32 tiles (C = full softmax dim).
    g = g_ref[...]
    y = y_ref[...]
    s = jnp.sum(g * y, axis=1, keepdims=True)   # XLU reduction over dim 1
    o_ref[...] = y * (g - s)                    # no live g*y tile at the store


def _pick_lane_tile(C, L):
    # Prefer a full-L block: fully contiguous DMA, fewest grid steps.
    if C * L * _ELEM_BYTES <= _TARGET_BLOCK_BYTES:
        return L
    # Need to split L: lane tiles must be a multiple of 128 (or the full dim).
    if L < 128 or L % 128 != 0:
        # TODO(synk): lane-unfriendly L (<128 / not a multiple of 128) takes the
        # masked-store path; folding dims in the wrapper is not possible here
        # because the softmax dim sits between batch and L.
        return L
    d = L // 128
    for m in range(d, 0, -1):  # largest multiple-of-128 divisor that fits budget
        if d % m == 0 and C * m * 128 * _ELEM_BYTES <= _TARGET_BLOCK_BYTES:
            return m * 128
    return 128


def _pick_batch_tile(B, C, TL):
    target_elems = _TARGET_BLOCK_BYTES // _ELEM_BYTES
    return max(1, min(B, target_elems // max(1, C * TL)))


def _fused_call(g, y, TB, TL):
    B, C, L = g.shape
    nb = (B + TB - 1) // TB
    nl = L // TL
    # Keep at least two grid steps so v7x can shard across its two TensorCores.
    if nb * nl == 1 and B >= 2:
        TB = (B + 1) // 2
        nb = (B + TB - 1) // TB

    block = pl.BlockSpec((TB, C, TL), lambda b, l: (b, 0, l))
    grid_spec = pltpu.PrefetchScalarGridSpec(
        num_scalar_prefetch=0,
        grid=(nb, nl),
        in_specs=[block, block],
        out_specs=pl.BlockSpec((TB, C, TL), lambda b, l: (b, 0, l)),
    )
    return pl.pallas_call(
        _softmax_backward_fused_kernel,
        out_shape=jax.ShapeDtypeStruct((B, C, L), jnp.float32),
        grid_spec=grid_spec,
        compiler_params=pltpu.CompilerParams(
            # Every grid step is fully independent -> both axes parallel.
            dimension_semantics=("parallel", "parallel"),
            vmem_limit_bytes=_VMEM_LIMIT_BYTES,
        ),
    )(g, y)


# ---------------------------------------------------------------------------
# Fallback path for very large softmax dims (C): two passes.
#   Pass 1: s[b, 0, l] = sum_c g[b, c, l] * y[b, c, l]   (C axis "arbitrary")
#   Pass 2: o[b, c, l] = y * (g - s)
# ---------------------------------------------------------------------------
def _sum_gy_kernel(g_ref, y_ref, s_ref, acc_ref, *, c_total):
    c = pl.program_id(2)

    @pl.when(c == 0)
    def _():
        acc_ref[...] = jnp.zeros_like(acc_ref)

    g = g_ref[...]
    y = y_ref[...]
    tb, tc, tl = g.shape
    # Mask rows past C (the ragged last C block reads unspecified padding).
    row = c * tc + lax.broadcasted_iota(jnp.int32, (tb, tc, tl), 1)
    gy = jnp.where(row < c_total, g * y, 0.0)
    acc_ref[...] += jnp.sum(gy, axis=1, keepdims=True)

    @pl.when(c == pl.num_programs(2) - 1)
    def _():
        s_ref[...] = acc_ref[...]


def _apply_kernel(g_ref, y_ref, s_ref, o_ref):
    o_ref[...] = y_ref[...] * (g_ref[...] - s_ref[...])


def _pick_fallback_tiles(C, L):
    target_elems = _TARGET_BLOCK_BYTES // _ELEM_BYTES
    if L < 128 or L % 128 != 0:
        TL = L
    else:
        d = L // 128
        m = 1
        for cand in range(min(d, 8), 0, -1):   # cap TL at 1024 to leave room for TC
            if d % cand == 0:
                m = cand
                break
        TL = m * 128
    TC = max(8, (target_elems // max(TL, 1)) // 8 * 8)
    TC = min(TC, max(8, C))
    return TC, TL


def _two_pass_call(g, y):
    B, C, L = g.shape
    TC, TL = _pick_fallback_tiles(C, L)
    nc = (C + TC - 1) // TC
    nl = L // TL

    gy_block = pl.BlockSpec((1, TC, TL), lambda b, l, c: (b, c, l))
    s_block = pl.BlockSpec((1, 1, TL), lambda b, l, c: (b, 0, l))

    s = pl.pallas_call(
        functools.partial(_sum_gy_kernel, c_total=C),
        out_shape=jax.ShapeDtypeStruct((B, 1, L), jnp.float32),
        grid_spec=pltpu.PrefetchScalarGridSpec(
            num_scalar_prefetch=0,
            grid=(B, nl, nc),
            in_specs=[gy_block, gy_block],
            out_specs=s_block,
            scratch_shapes=[pltpu.VMEM((1, 1, TL), jnp.float32)],
        ),
        compiler_params=pltpu.CompilerParams(
            dimension_semantics=("parallel", "parallel", "arbitrary"),
            vmem_limit_bytes=_VMEM_LIMIT_BYTES,
        ),
    )(g, y)

    gy_block2 = pl.BlockSpec((1, TC, TL), lambda b, c, l: (b, c, l))
    s_block2 = pl.BlockSpec((1, 1, TL), lambda b, c, l: (b, 0, l))
    return pl.pallas_call(
        _apply_kernel,
        out_shape=jax.ShapeDtypeStruct((B, C, L), jnp.float32),
        grid_spec=pltpu.PrefetchScalarGridSpec(
            num_scalar_prefetch=0,
            grid=(B, nc, nl),
            in_specs=[gy_block2, gy_block2, s_block2],
            out_specs=gy_block2,
        ),
        compiler_params=pltpu.CompilerParams(
            dimension_semantics=("parallel", "parallel", "parallel"),
            vmem_limit_bytes=_VMEM_LIMIT_BYTES,
        ),
    )(g, y, s)


# ---------------------------------------------------------------------------
# Public entry point.
# ---------------------------------------------------------------------------
@jax.jit
def softmax_backward(grad_output, output):
    """aten._softmax_backward_data(grad_output, output, dim=1, input_dtype=f32)."""
    B, C, L = grad_output.shape
    TL = _pick_lane_tile(C, L)
    if C * TL * _ELEM_BYTES <= _MAX_FUSED_BLOCK_BYTES:
        TB = _pick_batch_tile(B, C, TL)
        return _fused_call(grad_output, output, TB, TL)
    # Softmax dim too large for a single block: split C across the grid.
    return _two_pass_call(grad_output, output)


def _reference(grad_output, output):
    return output * (grad_output -
                     jnp.sum(grad_output * output, axis=1, keepdims=True))


if __name__ == "__main__":
    key = jax.random.PRNGKey(0)
    k1, k2 = jax.random.split(key)

    # Small rank-3 shapes consistent with the module's (-1, -1, -1) signature;
    # softmax dim is dim=1.
    B, C, L = 2, 4, 16
    logits = jax.random.normal(k1, (B, C, L), jnp.float32)
    output = jax.nn.softmax(logits, axis=1)            # a valid softmax output
    grad_output = jax.random.normal(k2, (B, C, L), jnp.float32)

    grad_input = softmax_backward(grad_output, output)
    jax.block_until_ready(grad_input)

    ref = _reference(grad_output, output)
    np.testing.assert_allclose(np.asarray(grad_input), np.asarray(ref),
                               rtol=1e-5, atol=1e-5)

    print("KERNEL_OK")
</pallas_src>

<mosaic_0001>
module attributes {stable_mosaic.version = 11 : i64} {
  func.func @_softmax_backward_fused_kernel(%arg0: i32, %arg1: i32, %arg2: memref<1x4x16xf32, #tpu.memory_space<vmem>>, %arg3: memref<1x4x16xf32, #tpu.memory_space<vmem>>, %arg4: memref<1x4x16xf32, #tpu.memory_space<vmem>>) attributes {dimension_semantics = [#tpu.dimension_semantics<parallel>, #tpu.dimension_semantics<parallel>], iteration_bounds = array<i64: 2, 1>, scalar_prefetch = 0 : i64, scratch_operands = 0 : i64, tpu.core_type = #tpu.core_type<tc>, window_params = [{transform_indices = @transform_0, window_bounds = array<i64: 1, 4, 16>}, {transform_indices = @transform_1, window_bounds = array<i64: 1, 4, 16>}, {transform_indices = @transform_2, window_bounds = array<i64: 1, 4, 16>}]} {
    %c0 = arith.constant 0 : index
    %c0_0 = arith.constant 0 : index
    %c0_1 = arith.constant 0 : index
    %0 = vector.load %arg2[%c0, %c0_0, %c0_1] : memref<1x4x16xf32, #tpu.memory_space<vmem>>, vector<1x4x16xf32>
    %c0_2 = arith.constant 0 : index
    %c0_3 = arith.constant 0 : index
    %c0_4 = arith.constant 0 : index
    %1 = vector.load %arg3[%c0_2, %c0_3, %c0_4] : memref<1x4x16xf32, #tpu.memory_space<vmem>>, vector<1x4x16xf32>
    %2 = arith.mulf %0, %1 : vector<1x4x16xf32>
    %cst = arith.constant dense<0.000000e+00> : vector<1x16xf32>
    %3 = vector.multi_reduction <add>, %2, %cst [1] : vector<1x4x16xf32> to vector<1x16xf32>
    %4 = vector.shape_cast %3 : vector<1x16xf32> to vector<1x1x16xf32>
    %5 = vector.broadcast %4 : vector<1x1x16xf32> to vector<1x4x16xf32>
    %6 = arith.subf %0, %5 : vector<1x4x16xf32>
    %7 = arith.mulf %1, %6 : vector<1x4x16xf32>
    %c0_5 = arith.constant 0 : index
    %c0_6 = arith.constant 0 : index
    %c0_7 = arith.constant 0 : index
    %8 = vector.load %arg4[%c0_5, %c0_6, %c0_7] : memref<1x4x16xf32, #tpu.memory_space<vmem>>, vector<1x4x16xf32>
    tpu.vector_store %arg4[%c0_5, %c0_6, %c0_7], %7 {strides = array<i32>} : memref<1x4x16xf32, #tpu.memory_space<vmem>>, vector<1x4x16xf32>,
    return
  }
  func.func @transform_0(%arg0: i32, %arg1: i32) -> (i32, i32, i32) {
    %c0_i32 = arith.constant 0 : i32
    %c0_i32_0 = arith.constant 0 : i32
    return %arg0, %c0_i32, %arg1 : i32, i32, i32
  }
  func.func @transform_1(%arg0: i32, %arg1: i32) -> (i32, i32, i32) {
    %c0_i32 = arith.constant 0 : i32
    %c0_i32_0 = arith.constant 0 : i32
    return %arg0, %c0_i32, %arg1 : i32, i32, i32
  }
  func.func @transform_2(%arg0: i32, %arg1: i32) -> (i32, i32, i32) {
    %c0_i32 = arith.constant 0 : i32
    %c0_i32_0 = arith.constant 0 : i32
    return %arg0, %c0_i32, %arg1 : i32, i32, i32
  }
}

</mosaic_0001>

<bundles_post_ra>
// kernel: softmax_backward.1
= control target key start
LH: loop header
LB: loop body
LE: loop exit
PB: predicated region body
PF: predicated region fallthrough
CT: control target
= control target key end

     0   :  { %7 = vsyncpa [#allocation3], 0  ;;  %s755_s0 = inlined_call_operand.hbm [shape: f32[2,4,16], index: 0, kind: input, shape index: {}]   ;;  %s756_s1 = inlined_call_operand.hbm [shape: f32[2,4,16], index: 1, kind: input, shape index: {}]   ;;  %s757_s2 = inlined_call_operand.hbm [shape: f32[2,4,16], index: 2, kind: output, shape index: {}]  }
   0x1   :  { %9 = vsyncpa [#allocation3 + $0x1], 0 }
   0x2   :  { %10 = vsyncpa [#allocation6], 0 }
   0x3   :  { %12 = vsyncpa [#allocation6 + $0x1], 0 }
   0x4   :  { %13 = vsyncpa [#allocation4], 0 }
   0x5   :  { %15 = vsyncpa [#allocation4 + $0x1], 0  ;;  %s592_s9 = smov 0   ;;  %s594_s10 = smov 0  }
   0x6   :  { %s596_s11 = smov 0   ;;  %s598_s12 = smov 0  }
   0x7   :  { %s600_s13 = smov 0   ;;  %s602_s14 = smov 0  }
   0x8 LB: > { %s349_s15 = sadd.s32 4294967295, %s572_s14   ;;  %s350_s16 = sadd.s32 4294967294, %s572_s14   ;;  %s572_s14 = sphi %s602_s14, %s21_s14   ;;  %s568_s13 = sphi %s600_s13, %s769_s13   ;;  %s564_s12 = sphi %s598_s12, %s768_s12   ;;  %s560_s11 = sphi %s596_s11, %s767_s11   ;;  %s556_s10 = sphi %s594_s10, %s766_s10   ;;  %s552_s9 = sphi %s592_s9, %s765_s9  }
   0x9   : > { %s33_s17 = sadd.s32 1, %s568_s13  ;;  %s42_s18 = sadd.s32 1, %s560_s11 }
   0xa   : > { %p35_p0 = scmp.ge.s32.totalorder %s33_s17, 2  ;;  %p49_p1 = scmp.ne.s32.totalorder %s560_s11, %s556_s10 }
   0xb   : > { %p50_p2 = scmp.eq.s32.totalorder %s572_s14, 0  ;;  %p55_p3 = scmp.ne.s32.totalorder %s556_s10, %s552_s9 }
   0xc   : > { %s771_s17 = smov (%p35_p0, %s33_s17), 0  ;;  %p56_p5 = scmp.eq.s32.totalorder %s349_s15, 0 }
   0xd   : > { %p633_p4 = por %p50_p2, %p49_p1  ;;  %s37_s20 = ssub.s32 %s568_s13, %s771_s17 }
   0xe   : > { %p109_p6 = scmp.eq.s32.totalorder %s349_s15, 1  ;;  %p40_p7 = scmp.eq.s32.totalorder %s37_s20, 0 }
   0xf   : > { %p639_p8 = por %p56_p5, %p55_p3  ;;  %p115_p10 = scmp.eq.s32.totalorder %s350_s16, 1 }
  0x10   : > { %p643_p9 = por %p109_p6, %p49_p1  ;;  %p382_p13 = scmp.lt.s32.totalorder %s572_s14, 2 }
  0x11   : > { %s648_s23 = scalar_select %p40_p7, %s560_s11, %s42_s18  }
  0x12   : > { %p650_p11 = por %p115_p10, %p55_p3  ;;  %s657_s25 = sand.u32 1, %s560_s11  }
  0x13   : > { %s353_s26 = sshll.u32 %s657_s25, 2  ;;  %s354_s27 = sshll.u32 %s568_s13, 6 }
  0x14   : > { %s145_s30 = scalar_lea.hbm %s755_s0, %s354_s27  ;;  %s139_s3 = scalar_lea.vmem [#allocation2], %s353_s26 }
  0x15   : > { %s147_s4 = sshll.u32 %s139_s3, 4  ;;  %p666_p0 = pnand %p382_p13, %p633_p4  ;;  %s148_s4 = int_to_ptr.vmem [resolvable:$true] %s147_s4 }
  0x16   : > { %p357_p1 = scmp.ge.s32.totalorder %s572_s14, 1  ;;  %p171_p2 = scmp.lt.s32.totalorder %s572_s14, 3 }
  0x17   : > { %s136_s6 = scalar_lea.sflag [#allocation3], %s657_s25  ;;  %p434_p3 = pneg %p666_p0 }
  0x18   : > { %s445_s7 = scalar_lea.vmem %s148_s4, 64  ;;  %s574_s8 = smov [#allocation2]  }
  0x19   : > { %p446_p5 = scmp.ne.s32.totalorder %s148_s4, %s445_s7  ;;  %s450_s15 = sshll.u32 %s574_s8, 4  ;;  %s451_s15 = int_to_ptr.vmem [resolvable:$false] %s450_s15 }
  0x1a   : > { %s452_s16 = scalar_lea.vmem %s451_s15, 128  ;;  %p453_p4 = scmp.lt.s32.totalorder %s148_s4, %s451_s15 }
  0x1b   : > { %p448_p6 = pnand %p446_p5, %p434_p3  ;;  %p454_p10 = scmp.lt.s32.totalorder %s452_s16, %s445_s7 }
  0x1d   : > { %p449_p7 = pneg %p448_p6  ;;  %p455_p13 = por %p454_p10, %p453_p4 }
  0x1f   : > { %p456_p12 = pnand %p455_p13, %p449_p7 }
  0x21   : > { %459 = shalt.err (!%p456_p12)
}
  0x22   : > { %374 = dma.hbm_to_vmem [thread:$0]  (!%p666_p0), %s145_s30, 64, %s148_s4, %s136_s6  }
  0x23   : > { %p684_p5 = pnand %p357_p1, %p171_p2  ;;  %s164_s28 = scalar_lea.hbm %s756_s1, %s354_s27 }
  0x24   : > { %s158_s29 = scalar_lea.vmem [#allocation5], %s353_s26  ;;  %s155_s7 = scalar_lea.sflag [#allocation6], %s657_s25 }
  0x25   : > { %s166_s3 = sshll.u32 %s158_s29, 4  ;;  %s575_s30 = smov [#allocation5]   ;;  %s167_s3 = int_to_ptr.vmem [resolvable:$true] %s166_s3 }
  0x26   : > { %s473_s8 = scalar_lea.vmem %s167_s3, 64  ;;  %s478_s4 = sshll.u32 %s575_s30, 4  ;;  %s479_s4 = int_to_ptr.vmem [resolvable:$false] %s478_s4 }
  0x27   : > { %p474_p12 = scmp.ne.s32.totalorder %s167_s3, %s473_s8  ;;  %s480_s6 = scalar_lea.vmem %s479_s4, 128 }
  0x28   : > { %p481_p1 = scmp.lt.s32.totalorder %s167_s3, %s479_s4  ;;  %p482_p2 = scmp.lt.s32.totalorder %s480_s6, %s473_s8 }
  0x29   : > { %p476_p6 = pnand %p474_p12, %p434_p3 }
  0x2a   : > { %p483_p4 = por %p482_p2, %p481_p1 }
  0x2b   : > { %p477_p7 = pneg %p476_p6 }
  0x2d   : > { %p484_p10 = pnand %p483_p4, %p477_p7 }
  0x2f   : > { %487 = shalt.err (!%p484_p10)
}
  0x30   : > { %377 = dma.hbm_to_vmem [thread:$0]  (!%p666_p0), %s164_s28, 64, %s167_s3, %s155_s7  }
  0x31   : > { %175 = sbr.rel (%p684_p5) target bundleno = 90 (0x5a), region = 28  ;;  %s700_s25 = sand.u32 (!%p684_p5), 1, %s556_s10  }
  0x32   : > { %s358_s26 = sshll.u32 (!%p684_p5), %s700_s25, 2  ;;  %s178_s27 = scalar_lea.sflag (!%p684_p5), [#allocation3], %s700_s25 }
  0x33   : > { %s181_s15 = scalar_lea.vmem (!%p684_p5), [#allocation2], %s358_s26 }
  0x36   : > { %539 = dma.done.wait (%p639_p8), %s178_s27, 64  }
  0x37   : > { %541 = vsyncadd (%p639_p8), %s178_s27, 4294967232  ;;  %s187_s5 = scalar_lea.sflag [#allocation6], %s700_s25  ;;  %s190_s16 = scalar_lea.vmem [#allocation5], %s358_s26 }
  0x38   : > { %543 = dma.done.wait (%p639_p8), %s187_s5, 64  }
  0x39   : > { %545 = vsyncadd (%p639_p8), %s187_s5, 4294967232  ;;  %v216_v0 = vld [vmem:[%s181_s15] sm:$0xf]  ;;  %v217_v1 = vld [vmem:[%s190_s16] sm:$0xf]  ;;  %vm219_vm0 = vcmask 125952  }
  0x3a   : > { %v218_v2 = vmul.f32 %v217_v1, %v216_v0  ;;  %s215_s18 = scalar_lea.vmem [#allocation7], %s358_s26  ;;  %s362_s20 = sshll.u32 %s564_s12, 6 }
  0x3b   : > { %s245_s19 = sshll.u32 %s215_s18, 4  ;;  %s243_s29 = scalar_lea.hbm %s757_s2, %s362_s20  ;;  %s246_s19 = int_to_ptr.vmem [resolvable:$true] %s245_s19 }
  0x3c   : > { %v220_v3 = vsel %vm219_vm0, %v218_v2, 0.0  ;;  %s231_s3 = scalar_lea.sflag [#allocation4], %s700_s25  ;;  %s488_s7 = scalar_lea.vmem %s246_s19, 64 }
  0x3d   : > { %v221_v4 = vrot.slane %v220_v3, 4  ;;  %p489_p8 = scmp.ne.s32.totalorder %s246_s19, %s488_s7  ;;  %s576_s8 = smov [#allocation7]  }
  0x3e   : > { %s492_s30 = sshll.u32 %s576_s8, 4  ;;  %s493_s30 = int_to_ptr.vmem [resolvable:$false] %s492_s30 }
  0x3f   : > { %v222_v5 = vadd.f32 %v221_v4, %v220_v3  ;;  %p490_p0 = pnand %p489_p8, %p643_p9  ;;  %s494_s4 = scalar_lea.vmem %s493_s30, 128 }
  0x40   : > { %p495_p13 = scmp.lt.s32.totalorder %s246_s19, %s493_s30  ;;  %p496_p5 = scmp.lt.s32.totalorder %s494_s4, %s488_s7 }
  0x41   : > { %v223_v6 = vrot.slane %v222_v5, 2  ;;  %p491_p3 = pneg %p490_p0 }
  0x42   : > { %p497_p12 = por %p496_p5, %p495_p13 }
  0x43   : > { %v224_v7 = vadd.f32 %v223_v6, %v222_v5 }
  0x44   : > { %p498_p6 = pnand %p497_p12, %p491_p3 }
  0x45   : > { %v225_v8 = vrot.slane %v224_v7, 1 }
  0x47   : > { %v226_v9 = vadd.f32 %v225_v8, %v224_v7 }
  0x49   : > { %v227_v10 = vsub.f32 %v216_v0, %v226_v9 }
  0x4b   : > { %v228_v11 = vmul.f32 %v227_v10, %v217_v1 }
  0x4d   : > { %229 = vst.msk [vmem:[%s215_s18] sm:$0xf] %vm219_vm0, %v228_v11 }
  0x4e   : > { %501 = shalt.err (!%p498_p6)
}
  0x4f   : > { %s502_s12 = scalar_lea.hbm %s243_s29, 64  ;;  %s506_s26 = scalar_lea.hbm %s757_s2, 128 }
  0x50   : > { %p503_p7 = scmp.ne.s32.totalorder %s243_s29, %s502_s12  ;;  %p507_p4 = scmp.lt.s32.totalorder %s243_s29, %s757_s2 }
  0x51   : > { %p508_p10 = scmp.lt.s32.totalorder %s506_s26, %s502_s12 }
  0x52   : > { %p504_p1 = pnand %p503_p7, %p643_p9 }
  0x53   : > { %p509_p8 = por %p508_p10, %p507_p4 }
  0x54   : > { %p505_p2 = pneg %p504_p1 }
  0x56   : > { %p510_p0 = pnand %p509_p8, %p505_p2 }
  0x58   : > { %513 = shalt.err (!%p510_p0)
}
  0x59   : > { %369 = dma.vmem_to_hbm [thread:$0]  (%p643_p9), %s246_s19, 64, %s243_s29, %s231_s3  }
  0x5a PF: > { %s257_s5 = sand.u32 1, %s552_s9   ;;  %p764_p3 = scmp.ge.s32.totalorder %s572_s14, 2 }
  0x5b   : > { %s258_s16 = scalar_lea.sflag [#allocation4], %s257_s5 }
  0x5c   : > { %p379_p13 = pnand %p764_p3, %p650_p11 }
  0x5e   : > { %p380_p5 = pneg %p379_p13 }
  0x60   : > { %547 = dma.done.wait (%p380_p5), %s258_s16, 64  }
  0x61   : > { %549 = vsyncadd (%p380_p5), %s258_s16, 4294967232  ;;  %s21_s14 = sadd.s32 1, %s572_s14   ;;  %s765_s9 = smov %s556_s10 }
  0x62   : > { %p18_p12 = scmp.ge.s32.totalorder %s21_s14, 4   ;;  %s766_s10 = smov %s560_s11 }
  0x63   : > { %s767_s11 = smov %s648_s23  ;;  %s768_s12 = smov %s568_s13 }
  0x64   : > { %s769_s13 = smov %s771_s17  ;;  %20 = sbr.rel (!%p18_p12) target bundleno = 8 (0x8), region = 86 }
  0x69   :  { %263 = vsyncpa [#allocation3], 1 }
  0x6a   :  { %265 = vsyncpa [#allocation3 + $0x1], 1 }
  0x6b   :  { %266 = vsyncpa [#allocation6], 1 }
  0x6c   :  { %268 = vsyncpa [#allocation6 + $0x1], 1 }
  0x6d   :  { %269 = vsyncpa [#allocation4], 1 }
  0x6e   :  { %271 = vsyncpa [#allocation4 + $0x1], 1 }

</bundles_post_ra>
